<compile_context>
chip_gen: v6e
topology: v6e:2x2x1
jax: 0.10.0
libtpu: 0.0.40
codegen_flags: <defaults>
</compile_context>

<pallas_src>
import functools

import jax
import jax.numpy as jnp
from jax.experimental import pallas as pl
from jax.experimental.pallas import tpu as pltpu


def _round_up(x, m):
    return ((x + m - 1) // m) * m


def model_kernel(tok_ref, emb_ref, w1_ref, b1_ref, w2_ref, b2_ref, out_ref,
                 *, num_class):
    # tok_ref : (TB, S)        int32   token ids (0 == padding)
    # emb_ref : (VPAD, EPAD)   bf16    padded embedding table (row 0 zero)
    # w1_ref  : (EPAD, HPAD)   bf16    fc1 weight (zero-padded)
    # b1_ref  : (1, HPAD)      f32
    # w2_ref  : (HPAD, CPAD)   bf16    fc2 weight (zero-padded)
    # b2_ref  : (1, CPAD)      f32
    # out_ref : (TB, CPAD)     f32     softmax probs (cols >= num_class are 0)
    tb, seq = tok_ref.shape
    vpad = emb_ref.shape[0]
    cpad = out_ref.shape[1]

    tok = tok_ref[...]                                          # (TB, S)

    # ---- per-row token histogram (counts over the padded vocab) ----------
    # NOTE: one-hot intermediate is (TB, S, VPAD); fine for modest S / vocab.
    v_iota = jax.lax.broadcasted_iota(jnp.int32, (1, vpad), 1)  # (1, VPAD)
    onehot = (tok[:, :, None] == v_iota[None, :, :]).astype(jnp.float32)
    counts = jnp.sum(onehot, axis=1)                            # (TB, VPAD)
    # drop padding token id 0 from both the pooled sum and the count
    counts = jnp.where(v_iota > 0, counts, 0.0)

    cnt = jnp.sum(counts, axis=1, keepdims=True)                # (TB, 1)
    cnt = jnp.maximum(cnt, 1.0)   # guard all-padding rows (batch padding)

    # ---- masked mean pooling as an MXU matmul: counts @ emb_table --------
    pooled = jnp.dot(counts.astype(jnp.bfloat16), emb_ref[...],
                     preferred_element_type=jnp.float32)        # (TB, EPAD)
    pooled = pooled * pl.reciprocal(cnt, approx=False)

    # ---- F.normalize (p=2, dim=1, eps=1e-12); padded feature cols are 0 ---
    sumsq = jnp.sum(pooled * pooled, axis=1, keepdims=True)
    pooled = pooled * jax.lax.rsqrt(jnp.maximum(sumsq, 1e-24))

    # ---- fc1 + ReLU  (dropout p=0.3 is identity at inference) ------------
    h = jnp.dot(pooled.astype(jnp.bfloat16), w1_ref[...],
                preferred_element_type=jnp.float32) + b1_ref[...]
    h = jnp.maximum(h, 0.0)

    # ---- fc2 + softmax over the real classes only ------------------------
    logits = jnp.dot(h.astype(jnp.bfloat16), w2_ref[...],
                     preferred_element_type=jnp.float32) + b2_ref[...]
    c_iota = jax.lax.broadcasted_iota(jnp.int32, (1, cpad), 1)  # (1, CPAD)
    cmask = c_iota < num_class
    m = jnp.max(jnp.where(cmask, logits, -1e30), axis=1, keepdims=True)
    e = jnp.where(cmask, jnp.exp(logits - m), 0.0)
    inv_den = pl.reciprocal(jnp.sum(e, axis=1, keepdims=True), approx=True)
    out_ref[...] = e * inv_den                                  # lane-dense store


def model_forward(tokens, emb_table, w1, b1, w2, b2, *, tb=8):
    """tokens: (B, S) int; returns (B, num_class) f32 softmax probabilities."""
    tokens = tokens.astype(jnp.int32)
    B, S = tokens.shape
    V, E = emb_table.shape          # num_vocab + 1, 16
    H = w1.shape[1]                 # 200
    C = w2.shape[1]                 # num_class

    # Pad every feature dim to a multiple of 128 (lane-dense layout).
    VPAD = _round_up(max(V, 128), 128)
    EPAD = _round_up(max(E, 128), 128)
    HPAD = _round_up(max(H, 128), 128)
    CPAD = _round_up(max(C, 128), 128)

    emb_pad = (jnp.zeros((VPAD, EPAD), jnp.float32)
               .at[:V, :E].set(emb_table.astype(jnp.float32))
               .astype(jnp.bfloat16))
    w1_pad = (jnp.zeros((EPAD, HPAD), jnp.float32)
              .at[:E, :H].set(w1.astype(jnp.float32))
              .astype(jnp.bfloat16))
    b1_pad = jnp.zeros((1, HPAD), jnp.float32).at[0, :H].set(b1.astype(jnp.float32))
    w2_pad = (jnp.zeros((HPAD, CPAD), jnp.float32)
              .at[:H, :C].set(w2.astype(jnp.float32))
              .astype(jnp.bfloat16))
    b2_pad = jnp.zeros((1, CPAD), jnp.float32).at[0, :C].set(b2.astype(jnp.float32))

    # Pad batch up to a multiple of the batch tile.
    B_pad = _round_up(B, tb)
    if B_pad != B:
        tokens = jnp.pad(tokens, ((0, B_pad - B), (0, 0)))

    kernel = functools.partial(model_kernel, num_class=C)

    out_pad = pl.pallas_call(
        kernel,
        out_shape=jax.ShapeDtypeStruct((B_pad, CPAD), jnp.float32),
        grid_spec=pltpu.PrefetchScalarGridSpec(
            num_scalar_prefetch=0,
            grid=(B_pad // tb,),
            in_specs=[
                pl.BlockSpec((tb, S), lambda i: (i, 0)),          # tokens (tiled)
                pl.BlockSpec((VPAD, EPAD), lambda i: (0, 0)),     # emb table (resident)
                pl.BlockSpec((EPAD, HPAD), lambda i: (0, 0)),     # w1
                pl.BlockSpec((1, HPAD), lambda i: (0, 0)),        # b1
                pl.BlockSpec((HPAD, CPAD), lambda i: (0, 0)),     # w2
                pl.BlockSpec((1, CPAD), lambda i: (0, 0)),        # b2
            ],
            out_specs=pl.BlockSpec((tb, CPAD), lambda i: (i, 0)),
        ),
        compiler_params=pltpu.CompilerParams(
            dimension_semantics=("parallel",),   # shard batch tiles across TCs
        ),
    )(tokens, emb_pad, w1_pad, b1_pad, w2_pad, b2_pad)

    return out_pad[:B, :C]


def reference_forward(tokens, emb_table, w1, b1, w2, b2):
    """Pure-JAX f32 reference matching the PyTorch forward."""
    cnt = jnp.sum(tokens != 0, axis=1, keepdims=True).astype(jnp.float32)
    emb = jnp.take(emb_table, tokens, axis=0)          # (B, S, 16)
    pooled = jnp.sum(emb, axis=1) / cnt
    norm = jnp.sqrt(jnp.sum(pooled * pooled, axis=1, keepdims=True))
    pooled = pooled / jnp.maximum(norm, 1e-12)
    h = jnp.maximum(pooled @ w1 + b1, 0.0)
    logits = h @ w2 + b2
    return jax.nn.softmax(logits, axis=1)


if __name__ == "__main__":
    key = jax.random.PRNGKey(0)
    k_tok, k_emb, k_w1, k_b1, k_w2, k_b2 = jax.random.split(key, 6)

    # Small shapes consistent with the module.
    B, S = 16, 8         # batch (2 tiles of 8), sequence length
    num_vocab = 50       # vocabulary size
    num_class = 4        # number of classes

    # Deterministic parameter init (synthetic; no checkpoint load).
    emb_table = jax.random.normal(k_emb, (num_vocab + 1, 16), jnp.float32) * 0.1
    emb_table = emb_table.at[0].set(0.0)  # padding_idx=0
    w1 = jax.random.normal(k_w1, (16, 200), jnp.float32) * 0.1
    b1 = jax.random.normal(k_b1, (200,), jnp.float32) * 0.01
    w2 = jax.random.normal(k_w2, (200, num_class), jnp.float32) * 0.1
    b2 = jax.random.normal(k_b2, (num_class,), jnp.float32) * 0.01

    # Token ids in [0, num_vocab]; force at least one non-padding token per row.
    tokens = jax.random.randint(k_tok, (B, S), 0, num_vocab + 1, jnp.int32)
    tokens = tokens.at[:, 0].set(jnp.maximum(tokens[:, 0], 1))

    out = model_forward(tokens, emb_table, w1, b1, w2, b2, tb=8)
    out = jax.block_until_ready(out)

    ref = reference_forward(tokens, emb_table, w1, b1, w2, b2)

    row_sums = jnp.sum(out, axis=1)
    assert out.shape == (B, num_class)
    assert bool(jnp.all(jnp.isfinite(out)))
    assert bool(jnp.all(jnp.abs(row_sums - 1.0) < 5e-3))       # approx recip slack
    assert bool(jnp.max(jnp.abs(out - ref)) < 2e-2)            # bf16-weight slack

    print("KERNEL_OK")
</pallas_src>

<mosaic_0001>
module attributes {stable_mosaic.version = 11 : i64} {
  func.func @model_kernel(%arg0: i32, %arg1: memref<8x8xi32, #tpu.memory_space<vmem>>, %arg2: memref<128x128xbf16, #tpu.memory_space<vmem>>, %arg3: memref<128x256xbf16, #tpu.memory_space<vmem>>, %arg4: memref<1x256xf32, #tpu.memory_space<vmem>>, %arg5: memref<256x128xbf16, #tpu.memory_space<vmem>>, %arg6: memref<1x128xf32, #tpu.memory_space<vmem>>, %arg7: memref<8x128xf32, #tpu.memory_space<vmem>>) attributes {dimension_semantics = [#tpu.dimension_semantics<parallel>], iteration_bounds = array<i64: 2>, scalar_prefetch = 0 : i64, scratch_operands = 0 : i64, tpu.core_type = #tpu.core_type<tc>, window_params = [{transform_indices = @transform_0, window_bounds = array<i64: 8, 8>}, {pipeline_mode = #tpu.pipeline_mode<synchronous>, transform_indices = @transform_1, window_bounds = array<i64: 128, 128>}, {pipeline_mode = #tpu.pipeline_mode<synchronous>, transform_indices = @transform_2, window_bounds = array<i64: 128, 256>}, {pipeline_mode = #tpu.pipeline_mode<synchronous>, transform_indices = @transform_3, window_bounds = array<i64: 1, 256>}, {pipeline_mode = #tpu.pipeline_mode<synchronous>, transform_indices = @transform_4, window_bounds = array<i64: 256, 128>}, {pipeline_mode = #tpu.pipeline_mode<synchronous>, transform_indices = @transform_5, window_bounds = array<i64: 1, 128>}, {transform_indices = @transform_6, window_bounds = array<i64: 8, 128>}]} {
    %c0 = arith.constant 0 : index
    %c0_0 = arith.constant 0 : index
    %0 = vector.load %arg1[%c0, %c0_0] : memref<8x8xi32, #tpu.memory_space<vmem>>, vector<8x8xi32>
    %1 = tpu.iota {dimensions = array<i32: 1>} : vector<1x128xi32>
    %2 = vector.shape_cast %0 : vector<8x8xi32> to vector<8x8x1xi32>
    %3 = vector.shape_cast %1 : vector<1x128xi32> to vector<1x1x128xi32>
    %4 = vector.broadcast %2 : vector<8x8x1xi32> to vector<8x8x128xi32>
    %5 = vector.broadcast %3 : vector<1x1x128xi32> to vector<8x8x128xi32>
    %6 = arith.cmpi eq, %4, %5 : vector<8x8x128xi32>
    %7 = arith.extui %6 : vector<8x8x128xi1> to vector<8x8x128xi32>
    %8 = arith.sitofp %7 : vector<8x8x128xi32> to vector<8x8x128xf32>
    %cst = arith.constant dense<0.000000e+00> : vector<8x128xf32>
    %9 = vector.multi_reduction <add>, %8, %cst [1] : vector<8x8x128xf32> to vector<8x128xf32>
    %c0_i32 = arith.constant 0 : i32
    %10 = vector.broadcast %c0_i32 : i32 to vector<1x128xi32>
    %11 = arith.cmpi sgt, %1, %10 : vector<1x128xi32>
    %cst_1 = arith.constant 0.000000e+00 : f32
    %12 = vector.shape_cast %11 : vector<1x128xi1> to vector<1x128xi1>
    %13 = vector.broadcast %12 : vector<1x128xi1> to vector<8x128xi1>
    %14 = vector.broadcast %cst_1 : f32 to vector<8x128xf32>
    %15 = arith.select %13, %9, %14 : vector<8x128xi1>, vector<8x128xf32>
    %cst_2 = arith.constant dense<0.000000e+00> : vector<8xf32>
    %16 = vector.multi_reduction <add>, %15, %cst_2 [1] : vector<8x128xf32> to vector<8xf32>
    %17 = vector.shape_cast %16 : vector<8xf32> to vector<8x1xf32>
    %cst_3 = arith.constant 1.000000e+00 : f32
    %18 = vector.broadcast %cst_3 : f32 to vector<8x1xf32>
    %19 = arith.maximumf %17, %18 : vector<8x1xf32>
    %20 = arith.truncf %15 : vector<8x128xf32> to vector<8x128xbf16>
    %c0_4 = arith.constant 0 : index
    %c0_5 = arith.constant 0 : index
    %21 = vector.load %arg2[%c0_4, %c0_5] : memref<128x128xbf16, #tpu.memory_space<vmem>>, vector<128x128xbf16>
    %cst_6 = arith.constant dense<0.000000e+00> : vector<8x128xf32>
    %22 = tpu.matmul %20, %21, %cst_6 {dimension_numbers = #tpu.dot_dimension_numbers<[1], [0], [0], [1], [0, 0, 1, 1], [], []>} : vector<8x128xbf16>, vector<128x128xbf16>, vector<8x128xf32> -> vector<8x128xf32>
    %23 = tpu.reciprocal %19 : vector<8x1xf32> -> vector<8x1xf32>
    %24 = vector.broadcast %23 : vector<8x1xf32> to vector<8x128xf32>
    %25 = arith.mulf %22, %24 : vector<8x128xf32>
    %26 = arith.mulf %25, %25 : vector<8x128xf32>
    %cst_7 = arith.constant dense<0.000000e+00> : vector<8xf32>
    %27 = vector.multi_reduction <add>, %26, %cst_7 [1] : vector<8x128xf32> to vector<8xf32>
    %28 = vector.shape_cast %27 : vector<8xf32> to vector<8x1xf32>
    %cst_8 = arith.constant 1.000000e-24 : f32
    %29 = vector.broadcast %cst_8 : f32 to vector<8x1xf32>
    %30 = arith.maximumf %28, %29 : vector<8x1xf32>
    %31 = math.rsqrt %30 : vector<8x1xf32>
    %32 = vector.broadcast %31 : vector<8x1xf32> to vector<8x128xf32>
    %33 = arith.mulf %25, %32 : vector<8x128xf32>
    %34 = arith.truncf %33 : vector<8x128xf32> to vector<8x128xbf16>
    %c0_9 = arith.constant 0 : index
    %c0_10 = arith.constant 0 : index
    %35 = vector.load %arg3[%c0_9, %c0_10] : memref<128x256xbf16, #tpu.memory_space<vmem>>, vector<128x256xbf16>
    %cst_11 = arith.constant dense<0.000000e+00> : vector<8x256xf32>
    %36 = tpu.matmul %34, %35, %cst_11 {dimension_numbers = #tpu.dot_dimension_numbers<[1], [0], [0], [1], [0, 0, 1, 1], [], []>} : vector<8x128xbf16>, vector<128x256xbf16>, vector<8x256xf32> -> vector<8x256xf32>
    %c0_12 = arith.constant 0 : index
    %c0_13 = arith.constant 0 : index
    %37 = vector.load %arg4[%c0_12, %c0_13] : memref<1x256xf32, #tpu.memory_space<vmem>>, vector<1x256xf32>
    %38 = vector.broadcast %37 : vector<1x256xf32> to vector<8x256xf32>
    %39 = arith.addf %36, %38 : vector<8x256xf32>
    %cst_14 = arith.constant 0.000000e+00 : f32
    %40 = vector.broadcast %cst_14 : f32 to vector<8x256xf32>
    %41 = arith.maximumf %39, %40 : vector<8x256xf32>
    %42 = arith.truncf %41 : vector<8x256xf32> to vector<8x256xbf16>
    %c0_15 = arith.constant 0 : index
    %c0_16 = arith.constant 0 : index
    %43 = vector.load %arg5[%c0_15, %c0_16] : memref<256x128xbf16, #tpu.memory_space<vmem>>, vector<256x128xbf16>
    %cst_17 = arith.constant dense<0.000000e+00> : vector<8x128xf32>
    %44 = tpu.matmul %42, %43, %cst_17 {dimension_numbers = #tpu.dot_dimension_numbers<[1], [0], [0], [1], [0, 0, 1, 1], [], []>} : vector<8x256xbf16>, vector<256x128xbf16>, vector<8x128xf32> -> vector<8x128xf32>
    %c0_18 = arith.constant 0 : index
    %c0_19 = arith.constant 0 : index
    %45 = vector.load %arg6[%c0_18, %c0_19] : memref<1x128xf32, #tpu.memory_space<vmem>>, vector<1x128xf32>
    %46 = vector.broadcast %45 : vector<1x128xf32> to vector<8x128xf32>
    %47 = arith.addf %44, %46 : vector<8x128xf32>
    %48 = tpu.iota {dimensions = array<i32: 1>} : vector<1x128xi32>
    %c4_i32 = arith.constant 4 : i32
    %49 = vector.broadcast %c4_i32 : i32 to vector<1x128xi32>
    %50 = arith.cmpi slt, %48, %49 : vector<1x128xi32>
    %cst_20 = arith.constant -1.000000e+30 : f32
    %51 = vector.shape_cast %50 : vector<1x128xi1> to vector<1x128xi1>
    %52 = vector.broadcast %51 : vector<1x128xi1> to vector<8x128xi1>
    %53 = vector.broadcast %cst_20 : f32 to vector<8x128xf32>
    %54 = arith.select %52, %47, %53 : vector<8x128xi1>, vector<8x128xf32>
    %cst_21 = arith.constant dense<0xFF800000> : vector<8xf32>
    %55 = vector.multi_reduction <maximumf>, %54, %cst_21 [1] : vector<8x128xf32> to vector<8xf32>
    %56 = vector.shape_cast %55 : vector<8xf32> to vector<8x1xf32>
    %57 = vector.broadcast %56 : vector<8x1xf32> to vector<8x128xf32>
    %58 = arith.subf %47, %57 : vector<8x128xf32>
    %59 = math.exp %58 : vector<8x128xf32>
    %cst_22 = arith.constant 0.000000e+00 : f32
    %60 = vector.shape_cast %50 : vector<1x128xi1> to vector<1x128xi1>
    %61 = vector.broadcast %60 : vector<1x128xi1> to vector<8x128xi1>
    %62 = vector.broadcast %cst_22 : f32 to vector<8x128xf32>
    %63 = arith.select %61, %59, %62 : vector<8x128xi1>, vector<8x128xf32>
    %cst_23 = arith.constant dense<0.000000e+00> : vector<8xf32>
    %64 = vector.multi_reduction <add>, %63, %cst_23 [1] : vector<8x128xf32> to vector<8xf32>
    %65 = vector.shape_cast %64 : vector<8xf32> to vector<8x1xf32>
    %66 = tpu.reciprocal %65 {approx = true} : vector<8x1xf32> -> vector<8x1xf32>
    %67 = vector.broadcast %66 : vector<8x1xf32> to vector<8x128xf32>
    %68 = arith.mulf %63, %67 : vector<8x128xf32>
    %c0_24 = arith.constant 0 : index
    %c0_25 = arith.constant 0 : index
    %69 = vector.load %arg7[%c0_24, %c0_25] : memref<8x128xf32, #tpu.memory_space<vmem>>, vector<8x128xf32>
    tpu.vector_store %arg7[%c0_24, %c0_25], %68 {strides = array<i32>} : memref<8x128xf32, #tpu.memory_space<vmem>>, vector<8x128xf32>,
    return
  }
  func.func @transform_0(%arg0: i32) -> (i32, i32) {
    %c0_i32 = arith.constant 0 : i32
    %c0_i32_0 = arith.constant 0 : i32
    return %arg0, %c0_i32 : i32, i32
  }
  func.func @transform_1(%arg0: i32) -> (i32, i32) {
    %c0_i32 = arith.constant 0 : i32
    %c0_i32_0 = arith.constant 0 : i32
    %c0_i32_1 = arith.constant 0 : i32
    return %c0_i32, %c0_i32_0 : i32, i32
  }
  func.func @transform_2(%arg0: i32) -> (i32, i32) {
    %c0_i32 = arith.constant 0 : i32
    %c0_i32_0 = arith.constant 0 : i32
    %c0_i32_1 = arith.constant 0 : i32
    return %c0_i32, %c0_i32_0 : i32, i32
  }
  func.func @transform_3(%arg0: i32) -> (i32, i32) {
    %c0_i32 = arith.constant 0 : i32
    %c0_i32_0 = arith.constant 0 : i32
    %c0_i32_1 = arith.constant 0 : i32
    return %c0_i32, %c0_i32_0 : i32, i32
  }
  func.func @transform_4(%arg0: i32) -> (i32, i32) {
    %c0_i32 = arith.constant 0 : i32
    %c0_i32_0 = arith.constant 0 : i32
    %c0_i32_1 = arith.constant 0 : i32
    return %c0_i32, %c0_i32_0 : i32, i32
  }
  func.func @transform_5(%arg0: i32) -> (i32, i32) {
    %c0_i32 = arith.constant 0 : i32
    %c0_i32_0 = arith.constant 0 : i32
    %c0_i32_1 = arith.constant 0 : i32
    return %c0_i32, %c0_i32_0 : i32, i32
  }
  func.func @transform_6(%arg0: i32) -> (i32, i32) {
    %c0_i32 = arith.constant 0 : i32
    %c0_i32_0 = arith.constant 0 : i32
    return %arg0, %c0_i32 : i32, i32
  }
}

</mosaic_0001>

<bundles_post_ra>
// kernel: tpu_custom_call.1
= control target key start
LH: loop header
LB: loop body
LE: loop exit
PB: predicated region body
PF: predicated region fallthrough
CT: control target
= control target key end

     0   :  { %11 = vsyncpa [#allocation3], 0  ;;  %s1650_s0 = inlined_call_operand.vmem [shape: s32[16,8], index: 0, kind: input, shape index: {}]   ;;  %s1651_s1 = inlined_call_operand.hbm [shape: bf16[128,128], index: 1, kind: input, shape index: {}]   ;;  %s1652_s2 = inlined_call_operand.hbm [shape: bf16[128,256], index: 2, kind: input, shape index: {}]   ;;  %s1653_s3 = inlined_call_operand.vmem [shape: f32[1,256], index: 3, kind: input, shape index: {}]   ;;  %s1654_s4 = inlined_call_operand.hbm [shape: bf16[256,128], index: 4, kind: input, shape index: {}]   ;;  %s1655_s5 = inlined_call_operand.vmem [shape: f32[1,128], index: 5, kind: input, shape index: {}]   ;;  %s1656_s6 = inlined_call_operand.hbm [shape: f32[16,128], index: 6, kind: output, shape index: {}]  }
   0x1   :  { %12 = vsyncpa [#allocation6], 0 }
   0x2   :  { %13 = vsyncpa [#allocation4], 0 }
   0x3   :  { %15 = vsyncpa [#allocation4 + $0x1], 0  ;;  %s1460_s21 = smov 0   ;;  %s1462_s22 = smov 0  }
   0x4   :  { %s1464_s23 = smov 0   ;;  %s1466_s24 = smov 0  }
   0x5 LB: > { %s1481_s25 = sadd.s32 4294967295, %s1412_s24   ;;  %s1014_s26 = sadd.s32 4294967294, %s1412_s24   ;;  %s1412_s24 = sphi %s1466_s24, %s1670_s24   ;;  %s1408_s23 = sphi %s1464_s23, %s1669_s23   ;;  %s1404_s22 = sphi %s1462_s22, %s1668_s22   ;;  %s1400_s21 = sphi %s1460_s21, %s1667_s21  }
   0x6   : > { %s1485_s27 = sadd.s32 1, %s1412_s24   ;;  %s159_s28 = sadd.s32 1, %s1408_s23 }
   0x7   : > { %s156_s29 = ssub.s32 %s1412_s24, %s1485_s27  ;;  %p169_p0 = scmp.ne.s32.totalorder %s1408_s23, %s1404_s22 }
   0x8   : > { %p157_p1 = scmp.eq.s32.totalorder %s156_s29, 0  ;;  %p170_p2 = scmp.eq.s32.totalorder %s1481_s25, 1 }
   0x9   : > { %p175_p3 = scmp.ne.s32.totalorder %s1404_s22, %s1400_s21  ;;  %p176_p4 = scmp.eq.s32.totalorder %s1014_s26, 1 }
   0xa   : > { %s1496_s30 = scalar_select %p157_p1, %s1408_s23, %s159_s28  }
   0xb   : > { %p1498_p5 = por %p170_p2, %p169_p0  ;;  %p1502_p6 = por %p176_p4, %p175_p3 }
   0xc   : > { %p1015_p7 = scmp.ge.s32.totalorder %s1412_s24, 1  ;;  %p183_p8 = scmp.lt.s32.totalorder %s1412_s24, 3 }
   0xd   : > { %s1659_s8 = scalar_select %p1502_p6, 1, 0 }
   0xe   : > { %p1657_p9 = scmp.eq.s32.totalorder %s1481_s25, 0  ;;  %p1509_p10 = pnand %p1015_p7, %p183_p8 }
   0xf   : > { %s1414_s10 = smov [#allocation5]   ;;  %s1415_s13 = smov [#allocation2]  }
  0x10   : > { %s208_s11 = sshll.u32 %s1414_s10, 4  ;;  %p1147_p11 = pneg %p1509_p10  ;;  %s209_s11 = int_to_ptr.vmem [resolvable:$true] %s208_s11 }
  0x11   : > { %s195_s14 = sshll.u32 %s1415_s13, 4  ;;  %s1277_s15 = scalar_lea.vmem %s209_s11, 2048  ;;  %s196_s14 = int_to_ptr.vmem [resolvable:$true] %s195_s14 }
  0x12   : > { %p1517_p12 = pnand %p1657_p9, %p1147_p11  ;;  %p1278_p0 = scmp.ne.s32.totalorder %s209_s11, %s1277_s15 }
  0x13   : > { %p1285_p3 = scmp.lt.s32.totalorder %s209_s11, %s209_s11  ;;  %p1286_p4 = scmp.lt.s32.totalorder %s1277_s15, %s1277_s15 }
  0x14   : > { %p1268_p13 = pneg %p1517_p12 }
  0x15   : > { %p1287_p7 = por %p1286_p4, %p1285_p3 }
  0x16   : > { %p1280_p1 = pnand %p1278_p0, %p1268_p13 }
  0x18   : > { %p1281_p2 = pneg %p1280_p1 }
  0x1a   : > { %p1288_p8 = pnand %p1287_p7, %p1281_p2 }
  0x1c   : > { %1291 = shalt.err (!%p1288_p8)
}
  0x1d   : > { %s1416_s16 = smov 128   ;;  %s1417_s17 = smov 8  }
  0x1e   : > { %1153 = dma.hbm_to_vmem [thread:$0]  (!%p1517_p12), %s1652_s2, 2048, %s209_s11, [#allocation6], %s1416_s16, %s1416_s16, %s1417_s17  }
  0x1f   : > { %s1303_s20 = scalar_lea.vmem %s196_s14, 1024  ;;  %p1311_p9 = scmp.lt.s32.totalorder %s196_s14, %s196_s14 }
  0x20   : > { %p1304_p11 = scmp.ne.s32.totalorder %s196_s14, %s1303_s20  ;;  %p1312_p6 = scmp.lt.s32.totalorder %s1303_s20, %s1303_s20 }
  0x22   : > { %p1306_p0 = pnand %p1304_p11, %p1268_p13  ;;  %p1313_p3 = por %p1312_p6, %p1311_p9 }
  0x24   : > { %p1307_p1 = pneg %p1306_p0 }
  0x26   : > { %p1314_p2 = pnand %p1313_p3, %p1307_p1 }
  0x28   : > { %1317 = shalt.err (!%p1314_p2)
}
  0x29   : > { %s1418_s26 = smov 64   ;;  %s1419_s28 = smov 4  }
  0x2a   : > { %1150 = dma.hbm_to_vmem [thread:$0]  (!%p1517_p12), %s1651_s1, 1024, %s196_s14, [#allocation3], %s1418_s26, %s1418_s26, %s1419_s28  }
  0x2b   : > { %s1420_s11 = smov [#allocation7]  }
  0x2c   : > { %s224_s13 = sshll.u32 %s1420_s11, 4  ;;  %s225_s13 = int_to_ptr.vmem [resolvable:$true] %s224_s13 }
  0x2d   : > { %s1329_s15 = scalar_lea.vmem %s225_s13, 2048  ;;  %p1337_p9 = scmp.lt.s32.totalorder %s225_s13, %s225_s13 }
  0x2e   : > { %p1330_p4 = scmp.ne.s32.totalorder %s225_s13, %s1329_s15  ;;  %p1338_p8 = scmp.lt.s32.totalorder %s1329_s15, %s1329_s15 }
  0x30   : > { %p1332_p7 = pnand %p1330_p4, %p1268_p13  ;;  %p1339_p11 = por %p1338_p8, %p1337_p9 }
  0x32   : > { %p1333_p6 = pneg %p1332_p7 }
  0x34   : > { %p1340_p0 = pnand %p1339_p11, %p1333_p6 }
  0x36   : > { %1343 = shalt.err (!%p1340_p0)
}
  0x37   : > { %1156 = dma.hbm_to_vmem [thread:$0]  (!%p1517_p12), %s1654_s4, 2048, %s225_s13, [#allocation6], %s1418_s26, %s1418_s26, %s1419_s28  }
  0x38   : > { %250 = sbr.rel (%p1509_p10) target bundleno = 1300 (0x514), region = 44  ;;  %p1662_p1 = scmp.eq.s32.totalorder (!%p1509_p10), %s1481_s25, 0 }
  0x3d   : > { %1387 = dma.done.wait (%p1662_p1), [#allocation3], 1024   ;;  %p1663_p13 = pmov %p1662_p1 }
  0x3e   : > { %p1664_p3 = pmov %p1662_p1 }
  0x3f   : > { %1389 = vsyncadd (%p1663_p13), [#allocation3], 4294966272 }
  0x40   : > { %1391 = dma.done.wait (%p1664_p3), [#allocation6], 4096   ;;  %p1665_p2 = pmov %p1662_p1 }
  0x41   : > { %p287_p4 = scmp.lt.s32.totalorder %s1481_s25, 1  ;;  %v293_v0 = vlaneseq  ;;  %v1421_v1 = vmov 0.0   ;;  %v1210_v10 = vld [vmem:[#allocation2 + $0x38] sm:$0xff]   ;;  %v1211_v16 = vld [vmem:[#allocation2 + $0x30] sm:$0xff]   ;;  %v1212_v18 = vld [vmem:[#allocation2 + $0x28] sm:$0xff]   ;;  %vm1422_vm0 = vmmov 0  }
  0x42   : > { %1393 = vsyncadd (%p1665_p2), [#allocation6], 4294963200  ;;  %1113 = vmatprep.subr.bf16.mxu0 %v1421_v1  ;;  %v1213_v21 = vld [vmem:[#allocation2 + $0x20] sm:$0xff]   ;;  %v1214_v24 = vld [vmem:[#allocation2 + $0x18] sm:$0xff]   ;;  %1129 = vmatprep.mubr.msk.bf16.mxu0 %vm1422_vm0, %v1421_v1  ;;  %vm434_vm7 = vcmask 1041409   ;;  %vm436_vm10 = vcmask 1042434  }
  0x43   : > { %s288_s9 = scalar_select %p287_p4, %s1481_s25, 1  ;;  %v1560_v2 = vshrl.u32 %v293_v0, 7  ;;  %1114 = vmatpush3.bf16.msra.mxu0 %v1210_v10  ;;  %v1215_v25 = vld [vmem:[#allocation2 + $0x10] sm:$0xff]   ;;  %v1216_v26 = vld [vmem:[#allocation2 + $0x8] sm:$0xff]   ;;  %v1217_v27 = vld [vmem:[#allocation2] sm:$0xff]   ;;  %v1585_v28 = vand.u32 127, %v293_v0 }
  0x44   : > { %1115 = vmatprep.subr.bf16.mxu0 %v1421_v1  ;;  %vm438_vm11 = vcmask 1043459   ;;  %vm440_vm12 = vcmask 1044484   ;;  %vm442_vm13 = vcmask 1045509   ;;  %vm444_vm15 = vcmask 1046534   ;;  %s284_s10 = sand.u32 1, %s1404_s22   ;;  %s1079_s13 = sshll.u32 %s1481_s25, 7 }
  0x45   : > { %s1025_s12 = sshll.u32 %s288_s9, 3  ;;  %v311_v3 = vsub.s32 2, %v1560_v2  ;;  %v297_v4 = vsub.s32 0, %v1560_v2  ;;  %v318_v5 = vsub.s32 3, %v1560_v2  ;;  %v304_v6 = vsub.s32 1, %v1560_v2  ;;  %s1024_s11 = sshll.u32 %s284_s10, 3 }
  0x46   : > { %s290_s19 = scalar_lea.vmem %s1650_s0, %s1025_s12  ;;  %v332_v11 = vsub.s32 5, %v1560_v2  ;;  %v325_v12 = vsub.s32 4, %v1560_v2  ;;  %v346_v15 = vsub.s32 7, %v1560_v2  ;;  %v339_v17 = vsub.s32 6, %v1560_v2  ;;  %s286_s15 = scalar_lea.vmem [#allocation8], %s1024_s11 }
  0x47   : > { %v292_v7 = vld [vmem:[%s290_s19] sm:$0xff]  ;;  %1116 = vmatpush3.bf16.msra.mxu0 %v1211_v16  ;;  %vm423_vm14 = vcmp.gt.s32.totalorder %v1585_v28, 0  ;;  %vm446_vm0 = vcmask 1047559   ;;  %s924_s16 = sshll.u32 %s286_s15, 4  ;;  %s922_s12 = scalar_lea.hbm %s1656_s6, %s1079_s13  ;;  %s925_s16 = int_to_ptr.vmem [resolvable:$true] %s924_s16 }
  0x48   : > { %v312_v8 = vrot.slane %v292_v7, %v311_v3  ;;  %v298_v9 = vrot.slane %v292_v7, %v297_v4  ;;  %v319_v13 = vrot.slane %v292_v7, %v318_v5  ;;  %v305_v14 = vrot.slane %v292_v7, %v304_v6  ;;  %1117 = vmatprep.subr.bf16.mxu0 %v1421_v1  ;;  %s911_s14 = scalar_lea.sflag [#allocation4], %s284_s10  ;;  %s1344_s18 = scalar_lea.vmem %s925_s16, 128 }
  0x49   : > { %v333_v19 = vrot.slane %v292_v7, %v332_v11  ;;  %v326_v20 = vrot.slane %v292_v7, %v325_v12  ;;  %v347_v22 = vrot.slane %v292_v7, %v346_v15  ;;  %v340_v23 = vrot.slane %v292_v7, %v339_v17  ;;  %p1345_p10 = scmp.ne.s32.totalorder %s925_s16, %s1344_s18  ;;  %s1424_s19 = smov [#allocation8]  }
  0x4a   : > { %314 = vbcast.lane.b32.xlu1 %v312_v8, 256  ;;  %300 = vbcast.lane.b32.xlu0 %v298_v9, 256  ;;  %s1348_s20 = sshll.u32 %s1424_s19, 4  ;;  %s1349_s20 = int_to_ptr.vmem [resolvable:$false] %s1348_s20 }
  0x4b   : > { %1118 = vmatpush3.bf16.msra.mxu0 %v1212_v18  ;;  %p1346_p12 = pnand %p1345_p10, %p1498_p5  ;;  %s1350_s25 = scalar_lea.vmem %s1349_s20, 256 }
  0x4c   : > { %1119 = vmatprep.subr.bf16.mxu0 %v1421_v1  ;;  %p1351_p6 = scmp.lt.s32.totalorder %s925_s16, %s1349_s20  ;;  %p1352_p9 = scmp.lt.s32.totalorder %s1350_s25, %s1344_s18 }
  0x4d   : > { %p1347_p7 = pneg %p1346_p12 }
  0x4e   : > { %321 = vbcast.lane.b32.xlu1 %v319_v13, 256  ;;  %307 = vbcast.lane.b32.xlu0 %v305_v14, 256  ;;  %p1353_p8 = por %p1352_p9, %p1351_p6 }
  0x4f   : > { %1120 = vmatpush3.bf16.msra.mxu0 %v1213_v21 }
  0x50   : > { %1121 = vmatprep.subr.bf16.mxu0 %v1421_v1  ;;  %p1354_p11 = pnand %p1353_p8, %p1347_p7 }
  0x52   : > { %335 = vbcast.lane.b32.xlu1 %v333_v19, 256  ;;  %328 = vbcast.lane.b32.xlu0 %v326_v20, 256 }
  0x53   : > { %1122 = vmatpush3.bf16.msra.mxu0 %v1214_v24 }
  0x54   : > { %1123 = vmatprep.subr.bf16.mxu0 %v1421_v1 }
  0x56   : > { %349 = vbcast.lane.b32.xlu1 %v347_v22, 256  ;;  %342 = vbcast.lane.b32.xlu0 %v340_v23, 256 }
  0x57   : > { %1124 = vmatpush3.bf16.msra.mxu0 %v1215_v25 }
  0x58   : > { %1125 = vmatprep.subr.bf16.mxu0 %v1421_v1 }
  0x5b   : > { %1126 = vmatpush3.bf16.msra.mxu0 %v1216_v26 }
  0x5c   : > { %1127 = vmatprep.subr.bf16.mxu0 %v1421_v1 }
  0x5f   : > { %1128 = vmatpush3.bf16.msra.mxu0 %v1217_v27 }
  0xbc   : > { %v315_v29 = vpop.permute.xlu1 %314  ;;  %v301_v30 = vpop.permute.xlu0 %300 }
  0xbd   : > { %vm353_vm1 = vcmp.eq.s32.totalorder %v315_v29, %v1585_v28  ;;  %vm351_vm2 = vcmp.eq.s32.totalorder %v301_v30, %v1585_v28 }
  0xbe   : > { %v1028_v31 = vsel %vm353_vm1, 1.0, %v1421_v1  ;;  %v1026_v32 = vsel %vm351_vm2, 1.0, %v1421_v1  ;;  %vm1042_vm1 = vmpackc.low %vm423_vm14, %vm423_vm14  ;;  %vm895_vm2 = vcmp.lt.s32.totalorder %v1585_v28, 4 }
  0xbf   : > { %v387_v33 = vrot.slane %v1028_v31, 4  ;;  %v375_v34 = vrot.slane %v1026_v32, 4 }
  0xc0   : > { %v322_v35 = vpop.permute.xlu1 %321  ;;  %v308_v36 = vpop.permute.xlu0 %307 }
  0xc1   : > { %v388_v37 = vadd.f32 %v1028_v31, %v387_v33  ;;  %v376_v38 = vadd.f32 %v1026_v32, %v375_v34  ;;  %vm354_vm3 = vcmp.eq.s32.totalorder %v322_v35, %v1585_v28  ;;  %vm352_vm4 = vcmp.eq.s32.totalorder %v308_v36, %v1585_v28 }
  0xc2   : > { %v1029_v39 = vsel %vm354_vm3, 1.0, %v1421_v1  ;;  %v1027_v40 = vsel %vm352_vm4, 1.0, %v1421_v1 }
  0xc3   : > { %v389_v41 = vrot.slane %v388_v37, 2  ;;  %v377_v42 = vrot.slane %v376_v38, 2  ;;  %v393_v43 = vrot.slane %v1029_v39, 4  ;;  %v381_v44 = vrot.slane %v1027_v40, 4 }
  0xc4   : > { %v336_v45 = vpop.permute.xlu1 %335  ;;  %v329_v46 = vpop.permute.xlu0 %328 }
  0xc5   : > { %v378_v47 = vadd.f32 %v377_v42, %v376_v38  ;;  %v394_v48 = vadd.f32 %v1029_v39, %v393_v43  ;;  %v382_v49 = vadd.f32 %v1027_v40, %v381_v44  ;;  %vm356_vm5 = vcmp.eq.s32.totalorder %v336_v45, %v1585_v28  ;;  %v1218_v42 = vld [vmem:[#allocation5 + $0x74] ss:$8 sps:$4 sm:$0xff]   ;;  %v1220_v43 = vld [vmem:[#allocation5 + $0x70] ss:$8 sps:$4 sm:$0xff]   ;;  %v1221_v44 = vld [vmem:[#allocation5 + $0x64] ss:$8 sps:$4 sm:$0xff]  }
  0xc6   : > { %vm355_vm6 = vcmp.eq.s32.totalorder %v329_v46, %v1585_v28  ;;  %v390_v50 = vadd.f32 %v389_v41, %v388_v37  ;;  %v1031_v53 = vsel %vm356_vm5, 1.0, %v1421_v1  ;;  %675 = vmatprep.subr.bf16.mxu1 %v1218_v42  ;;  %v1223_v45 = vld [vmem:[#allocation5 + $0x60] ss:$8 sps:$4 sm:$0xff]   ;;  %v1224_v46 = vld [vmem:[#allocation5 + $0x54] ss:$8 sps:$4 sm:$0xff]  }
  0xc7   : > { %v395_v51 = vrot.slane %v394_v48, 2  ;;  %v383_v52 = vrot.slane %v382_v49, 2  ;;  %v1030_v54 = vsel %vm355_vm6, 1.0, %v1421_v1  ;;  %v379_v57 = vrot.slane %v378_v47, 1  ;;  %676 = vmatpush1.bf16.msra.mxu1 %v1220_v43 }
  0xc8   : > { %v350_v55 = vpop.permute.xlu1 %349  ;;  %v343_v56 = vpop.permute.xlu0 %342  ;;  %v405_v60 = vrot.slane %v1031_v53, 4  ;;  %v399_v61 = vrot.slane %v1030_v54, 4  ;;  %v391_v62 = vrot.slane %v390_v50, 1  ;;  %677 = vmatprep.subr.bf16.mxu1 %v1221_v44 }
  0xc9   : > { %v396_v58 = vadd.f32 %v395_v51, %v394_v48  ;;  %v384_v59 = vadd.f32 %v383_v52, %v382_v49  ;;  %vm358_vm8 = vcmp.eq.s32.totalorder %v350_v55, %v1585_v28  ;;  %vm357_vm9 = vcmp.eq.s32.totalorder %v343_v56, %v1585_v28 }
  0xca   : > { %v1033_v0 = vsel %vm358_vm8, 1.0, %v1421_v1  ;;  %v1032_v3 = vsel %vm357_vm9, 1.0, %v1421_v1  ;;  %v406_v5 = vadd.f32 %v1031_v53, %v405_v60  ;;  %v400_v7 = vadd.f32 %v1030_v54, %v399_v61  ;;  %v1232_v60 = vld [vmem:[#allocation5 + $0x30] ss:$8 sps:$4 sm:$0xff]   ;;  %v1233_v61 = vld [vmem:[#allocation5 + $0x24] ss:$8 sps:$4 sm:$0xff]  }
  0xcb   : > { %v385_v63 = vrot.slane %v384_v59, 1  ;;  %v417_v8 = vrot.slane %v1033_v0, 4  ;;  %v411_v9 = vrot.slane %v1032_v3, 4  ;;  %v380_v10 = vadd.f32 %v379_v57, %v378_v47  ;;  %678 = vmatpush1.bf16.msra.mxu1 %v1223_v45  ;;  %v1226_v47 = vld [vmem:[#allocation5 + $0x50] ss:$8 sps:$4 sm:$0xff]  }
  0xcc   : > { %v397_v11 = vrot.slane %v396_v58, 1  ;;  %v407_v13 = vrot.slane %v406_v5, 2  ;;  %v401_v14 = vrot.slane %v400_v7, 2  ;;  %v392_v17 = vadd.f32 %v391_v62, %v390_v50  ;;  %679 = vmatprep.subr.bf16.mxu1 %v1224_v46  ;;  %v1227_v57 = vld [vmem:[#allocation5 + $0x44] ss:$8 sps:$4 sm:$0xff]  }
  0xcd   : > { %v386_v12 = vadd.f32 %v385_v63, %v384_v59  ;;  %v418_v15 = vadd.f32 %v1033_v0, %v417_v8  ;;  %v412_v16 = vadd.f32 %v1032_v3, %v411_v9  ;;  %v1230_v59 = vld [vmem:[#allocation5 + $0x34] ss:$8 sps:$4 sm:$0xff]   ;;  %v1423_v62 = vmov 0   ;;  %v1235_v63 = vld [vmem:[#allocation5 + $0x20] ss:$8 sps:$4 sm:$0xff]  }
  0xce   : > { %v408_v19 = vadd.f32 %v407_v13, %v406_v5  ;;  %v402_v20 = vadd.f32 %v401_v14, %v400_v7  ;;  %v398_v22 = vadd.f32 %v397_v11, %v396_v58  ;;  %v1229_v58 = vld [vmem:[#allocation5 + $0x40] ss:$8 sps:$4 sm:$0xff]   ;;  %707 = vmatprep.mubr.bf16.mxu1 %v1423_v62  ;;  %v1236_v0 = vld [vmem:[#allocation5 + $0x14] ss:$8 sps:$4 sm:$0xff]   ;;  %v1238_v3 = vld [vmem:[#allocation5 + $0x10] ss:$8 sps:$4 sm:$0xff]  }
  0xcf   : > { %v435_v18 = vsel %vm434_vm7, %v386_v12, %v380_v10  ;;  %v419_v21 = vrot.slane %v418_v15, 2  ;;  %v413_v1 = vrot.slane %v412_v16, 2  ;;  %680 = vmatpush1.bf16.msra.mxu1 %v1226_v47  ;;  %v1239_v5 = vld [vmem:[#allocation5 + $0x4] ss:$8 sps:$4 sm:$0xff]   ;;  %v1241_v7 = vld [vmem:[#allocation5] ss:$8 sps:$4 sm:$0xff]  }
  0xd0   : > { %v437_v23 = vsel %vm436_vm10, %v392_v17, %v435_v18  ;;  %v409_v24 = vrot.slane %v408_v19, 1  ;;  %v403_v25 = vrot.slane %v402_v20, 1  ;;  %681 = vmatprep.subr.bf16.mxu1 %v1227_v57  ;;  %v1242_v8 = vld [vmem:[#allocation7 + $0x78] sm:$0xff]   ;;  %v1244_v10 = vld [vmem:[#allocation7 + $0x70] sm:$0xff]   ;;  %v1246_v12 = vld [vmem:[#allocation7 + $0x68] sm:$0xff]  }
  0xd1   : > { %v420_v26 = vadd.f32 %v419_v21, %v418_v15  ;;  %v414_v27 = vadd.f32 %v413_v1, %v412_v16  ;;  %v439_v29 = vsel %vm438_vm11, %v398_v22, %v437_v23  ;;  %v1243_v9 = vld [vmem:[#allocation7 + $0x38] sm:$0xff]   ;;  %1091 = vmatprep.subr.bf16.mxu0 %v1242_v8  ;;  %v1245_v11 = vld [vmem:[#allocation7 + $0x30] sm:$0xff]   ;;  %v1247_v13 = vld [vmem:[#allocation7 + $0x28] sm:$0xff]  }
  0xd2   : > { %v410_v30 = vadd.f32 %v409_v24, %v408_v19  ;;  %v404_v31 = vadd.f32 %v403_v25, %v402_v20  ;;  %v1248_v14 = vld [vmem:[#allocation7 + $0x60] sm:$0xff]   ;;  %v1250_v16 = vld [vmem:[#allocation7 + $0x58] sm:$0xff]   ;;  %v1252_v18 = vld [vmem:[#allocation7 + $0x50] sm:$0xff]  }
  0xd3   : > { %v421_v32 = vrot.slane %v420_v26, 1  ;;  %v415_v33 = vrot.slane %v414_v27, 1  ;;  %682 = vmatpush1.bf16.msra.mxu1 %v1229_v58  ;;  %v1249_v15 = vld [vmem:[#allocation7 + $0x20] sm:$0xff]   ;;  %v1251_v17 = vld [vmem:[#allocation7 + $0x18] sm:$0xff]   ;;  %v1253_v19 = vld [vmem:[#allocation7 + $0x10] sm:$0xff]  }
  0xd4   : > { %v441_v36 = vsel %vm440_vm12, %v404_v31, %v439_v29  ;;  %683 = vmatprep.subr.bf16.mxu1 %v1230_v59  ;;  %v1254_v24 = vld [vmem:[#allocation7 + $0x48] sm:$0xff]   ;;  %v583_v29 = vld [vmem:[%s1653_s3] sm:$0x3] }
  0xd5   : > { %v416_v34 = vadd.f32 %v415_v33, %v414_v27  ;;  %v422_v35 = vadd.f32 %v421_v32, %v420_v26  ;;  %v443_v37 = vsel %vm442_vm13, %v410_v30, %v441_v36  ;;  %v1255_v25 = vld [vmem:[#allocation7 + $0x8] sm:$0xff]   ;;  %v1256_v26 = vld [vmem:[#allocation7 + $0x40] sm:$0xff]   ;;  %v588_v30 = vrot.slane %v583_v29, %v297_v4 }
  0xd6   : > { %v1257_v27 = vld [vmem:[#allocation7] sm:$0xff]   ;;  %v592_v31 = vrot.slane %v583_v29, %v304_v6 }
  0xd7   : > { %v445_v38 = vsel %vm444_vm15, %v416_v34, %v443_v37  ;;  %684 = vmatpush1.bf16.msra.mxu1 %v1232_v60  ;;  %v1061_v4 = vld [vmem:[%s1655_s5] ss:$0 sm:$0xff] }
  0xd8   : > { %v447_v39 = vsel %vm446_vm0, %v422_v35, %v445_v38  ;;  %685 = vmatprep.subr.bf16.mxu1 %v1233_v61 }
  0xd9   : > { %v449_v40 = vsel %vm423_vm14, %v447_v39, 0.0  ;;  %v1043_v41 = vpack.c.bf16 %v447_v39, %v447_v39 }
  0xda   : > { %450 = vadd.xlane.f32.xlu0 %v449_v40 }
  0xdb   : > { %1130 = vmatmul.mubr.msk.bf16.vlgmr.msra.gmra.mxu0 %vm1042_vm1, %v1043_v41  ;;  %686 = vmatpush1.bf16.msra.mxu1 %v1235_v63 }
  0xdc   : > { %687 = vmatprep.subr.bf16.mxu1 %v1236_v0  ;;  %1092 = vmatpush3.bf16.msra.mxu0 %v1243_v9 }
  0xdd   : > { %1093 = vmatprep.subr.bf16.mxu0 %v1244_v10 }
  0xdf   : > { %688 = vmatpush1.bf16.msra.mxu1 %v1238_v3 }
  0xe0   : > { %689 = vmatprep.subr.bf16.mxu1 %v1239_v5  ;;  %1094 = vmatpush3.bf16.msra.mxu0 %v1245_v11 }
  0xe1   : > { %1095 = vmatprep.subr.bf16.mxu0 %v1246_v12 }
  0xe3   : > { %690 = vmatpush1.bf16.msra.mxu1 %v1241_v7 }
  0xe4   : > { %1096 = vmatpush3.bf16.msra.mxu0 %v1247_v13 }
  0xe5   : > { %1097 = vmatprep.subr.bf16.mxu0 %v1248_v14 }
  0xe8   : > { %1098 = vmatpush3.bf16.msra.mxu0 %v1249_v15 }
  0xe9   : > { %1099 = vmatprep.subr.bf16.mxu0 %v1250_v16 }
  0xec   : > { %1100 = vmatpush3.bf16.msra.mxu0 %v1251_v17 }
  0xed   : > { %1101 = vmatprep.subr.bf16.mxu0 %v1252_v18 }
  0xf0   : > { %1102 = vmatpush3.bf16.msra.mxu0 %v1253_v19 }
  0xf1   : > { %1103 = vmatprep.subr.bf16.mxu0 %v1254_v24 }
  0xf4   : > { %1104 = vmatpush3.bf16.msra.mxu0 %v1255_v25 }
  0xf5   : > { %1105 = vmatprep.subr.bf16.mxu0 %v1256_v26 }
  0xf8   : > { %1106 = vmatpush3.bf16.msra.mxu0 %v1257_v27 }
 0x163   : > { %v451_v48 = vpop.xlane.xlu0 %450 }
 0x164   : > { %v452_v49 = vmax.f32 %v451_v48, 1.0 }
 0x166   : > { %1258 = vrcp.f32 %v452_v49 }
 0x173   : > { %v1259_v50 = vpop.eup %1258 }
 0x19b   : > { %v552_v51 = vpop.f32.mrf.mxu0 }
 0x19c   : > { %v559_v52 = vmul.f32 %v1259_v50, %v552_v51 }
 0x19d   : > { %v1131_v53 = vpop.f32.mrf.mxu0 }
 0x19e   : > { %v560_v54 = vmul.f32 %v559_v52, %v559_v52 }
 0x19f   : > { %v555_v55 = vpop.f32.mrf.mxu0 }
 0x1a0   : > { %561 = vadd.xlane.f32.xlu1 %v560_v54 }
 0x1a1   : > { %v1132_v56 = vpop.f32.mrf.mxu0 }
 0x229   : > { %v562_v20 = vpop.xlane.xlu1 %561 }
 0x22a   : > { %v563_v21 = vmax.f32 %v562_v20, 1e-24 }
 0x22c   : > { %1260 = vrsqrt.f32 %v563_v21 }
 0x239   : > { %v1261_v1 = vpop.eup %1260 }
 0x23a   : > { %v565_v22 = vmul.f32 %v1261_v1, %v559_v52 }
 0x23c   : > { %v566_v23 = vpack.c.bf16 %v565_v22, %v565_v22 }
 0x23e   : > { %708 = vmatmul.mubr.bf16.vlgmr.msra.gmra.mxu1 %v566_v23 }
 0x2fe   : > { %v709_v32 = vpop.f32.mrf.mxu1 }
 0x2ff   : > { %v710_v33 = vadd.f32 %v709_v32, %v588_v30 }
 0x300   : > { %v711_v34 = vpop.f32.mrf.mxu1 }
 0x301   : > { %v712_v35 = vadd.f32 %v711_v34, %v592_v31  ;;  %v716_v36 = vmax.f32 %v710_v33, 0.0 }
 0x302   : > { %v713_v37 = vpop.f32.mrf.mxu1 }
 0x303   : > { %v717_v38 = vmax.f32 %v712_v35, 0.0  ;;  %v718_v41 = vpack.c.bf16 %v716_v36, %v716_v36 }
 0x304   : > { %v714_v39 = vpop.f32.mrf.mxu1 }
 0x305   : > { %v719_v40 = vpack.c.bf16 %v717_v38, %v717_v38 }
 0x307   : > { %887 = vmatprep.mubr.bf16.mxu0 %v719_v40 }
 0x308   : > { %888 = vmatmul.mubr.bf16.vlgmr.msra.gmra.mxu0 %v718_v41 }
 0x3c8   : > { %v1107_v42 = vpop.f32.mrf.mxu0 }
 0x3ca   : > { %v1108_v43 = vpop.f32.mrf.mxu0 }
 0x3cb   : > { %v1109_v2 = vadd.f32 %v1108_v43, %v1107_v42 }
 0x3cc   : > { %v1110_v6 = vpop.f32.mrf.mxu0 }
 0x3cd   : > { %v890_v44 = vadd.f32 %v1109_v2, %v1061_v4 }
 0x3ce   : > { %v1111_v45 = vpop.f32.mrf.mxu0 }
 0x3cf   : > { %v898_v46 = vsel %vm895_vm2, %v890_v44, -1e+30 }
 0x3d0   : > { %899 = vmax.xlane.f32.xlu0 %v898_v46 }
 0x459   : > { %v900_v47 = vpop.xlane.xlu0 %899 }
 0x45a   : > { %v901_v48 = vsub.f32 %v890_v44, %v900_v47 }
 0x45c   : > { %v902_v49 = vmul.f32 1.442695, %v901_v48 }
 0x45e   : > { %1262 = vpow2.f32 %v902_v49 }
 0x46b   : > { %v1263_v50 = vpop.eup %1262 }
 0x46c   : > { %v904_v51 = vsel %vm895_vm2, %v1263_v50, 0.0 }
 0x46d   : > { %905 = vadd.xlane.f32.xlu0 %v904_v51 }
 0x4f6   : > { %v906_v52 = vpop.xlane.xlu0 %905 }
 0x4f7   : > { %1264 = vrcp.f32 %v906_v52 }
 0x504   : > { %v1265_v28 = vpop.eup %1264 }
 0x505   : > { %v908_v53 = vmul.f32 %v1265_v28, %v904_v51 }
 0x507   : > { %909 = vst [vmem:[%s286_s15] sm:$0xff] %v908_v53 }
 0x508   : > { %1357 = shalt.err (!%p1354_p11)
}
 0x509   : > { %s1358_s26 = scalar_lea.hbm %s922_s12, 128  ;;  %s1362_s10 = scalar_lea.hbm %s1656_s6, 256 }
 0x50a   : > { %p1359_p0 = scmp.ne.s32.totalorder %s922_s12, %s1358_s26  ;;  %p1363_p3 = scmp.lt.s32.totalorder %s922_s12, %s1656_s6 }
 0x50b   : > { %p1364_p2 = scmp.lt.s32.totalorder %s1362_s10, %s1358_s26 }
 0x50c   : > { %p1360_p1 = pnand %p1359_p0, %p1498_p5 }
 0x50d   : > { %p1365_p4 = por %p1364_p2, %p1363_p3 }
 0x50e   : > { %p1361_p13 = pneg %p1360_p1 }
 0x510   : > { %p1366_p10 = pnand %p1365_p4, %p1361_p13 }
 0x512   : > { %1369 = shalt.err (!%p1366_p10)
}
 0x513   : > { %1145 = dma.vmem_to_hbm [thread:$0]  (%p1498_p5), %s925_s16, 128, %s922_s12, %s911_s14  }
 0x514 PF: > { %p1167_p12 = scmp.ge.s32.totalorder %s1412_s24, 2  ;;  %s936_s15 = sand.u32 1, %s1400_s21  }
 0x515   : > { %p1666_p7 = scmp.ne.s32.totalorder %s1659_s8, 0  ;;  %s937_s17 = scalar_lea.sflag [#allocation4], %s936_s15 }
 0x517   : > { %p1158_p6 = pnand %p1167_p12, %p1666_p7 }
 0x519   : > { %p1159_p9 = pneg %p1158_p6 }
 0x51b   : > { %1395 = dma.done.wait (%p1159_p9), %s937_s17, 128  }
 0x51c   : > { %1397 = vsyncadd (%p1159_p9), %s937_s17, 4294967168  ;;  %p18_p8 = scmp.ge.s32.totalorder %s1485_s27, 4   ;;  %s1667_s21 = smov %s1404_s22 }
 0x51d   : > { %s1668_s22 = smov %s1408_s23  ;;  %s1669_s23 = smov %s1496_s30 }
 0x51e   : > { %s1670_s24 = smov %s1485_s27  ;;  %20 = sbr.rel (!%p18_p8) target bundleno = 5 (0x5), region = 92 }
 0x523   :  { %942 = vsyncpa [#allocation3], 1 }
 0x524   :  { %944 = vsyncpa [#allocation3 + $0x1], 1 }
 0x525   :  { %945 = vsyncpa [#allocation6], 1 }
 0x526   :  { %946 = vsyncpa [#allocation4], 1 }
 0x527   :  { %948 = vsyncpa [#allocation4 + $0x1], 1 }

</bundles_post_ra>
